<compile_context>
chip_gen: v7x
topology: tpu7x:2x2x1
jax: 0.10.0
libtpu: 0.0.40
codegen_flags: <defaults>
</compile_context>

<pallas_src>
import functools

import jax
import jax.numpy as jnp
from jax.experimental import pallas as pl
from jax.experimental.pallas import tpu as pltpu

_EPS = 1e-5
_HI = jax.lax.Precision.HIGHEST


def _fold(gamma):
    """Inference-mode BatchNorm scale (running_mean=0, running_var=1)."""
    return gamma / jnp.sqrt(1.0 + _EPS)


def _round_up(n, m):
    return ((n + m - 1) // m) * m


# ----------------------------------------------------------------------------
# pltpu.roll direction probe (pins jnp.roll-vs-opposite semantics at runtime)
# ----------------------------------------------------------------------------
def _roll_probe_kernel(x_ref, o_ref):
    o_ref[...] = pltpu.roll(x_ref[...], 1, 1)


def detect_roll_sign():
    """Return s such that pltpu.roll(v, (s*d) % N, 1)[:, q] == v[:, (q+d) % N]."""
    lane = jnp.broadcast_to(jnp.arange(128, dtype=jnp.float32), (8, 128))
    rolled = pl.pallas_call(
        _roll_probe_kernel,
        out_shape=jax.ShapeDtypeStruct((8, 128), jnp.float32),
    )(lane)
    v = float(jax.device_get(rolled)[0, 0])
    # v == 127 -> jnp.roll semantics (expected) -> use shift = -d
    return 1 if v == 1.0 else -1


# ----------------------------------------------------------------------------
# Fused kernel: one grid step == one full sub-proposal path
# ----------------------------------------------------------------------------
def fused_kernel(x_ref, nscale_ref, nbias_ref,
                 a1_ref, b1_ref, dw_ref, b2_ref, a3_ref, b3_ref,
                 lwpat_ref, pool_ref, lb_ref,
                 nw_ref, nb_ref,
                 haw_ref, hab_ref, hbw_ref, hbb_ref, hcw_ref, hcb_ref, post_ref,
                 o_ref, *, H, W, R, roll_sign):
    f32 = jnp.float32
    HW = H * W

    # ---- hoisted border masks for the depthwise 3x3 taps (shared by blocks)
    lane = jax.lax.broadcasted_iota(jnp.int32, (1, HW), 1)
    yq, xq = lane // W, lane % W

    def bounds_mask(dy, dx):
        m = None
        if dy != 0:
            m = jnp.logical_and(yq + dy >= 0, yq + dy < H)
        if dx != 0:
            mx = jnp.logical_and(xq + dx >= 0, xq + dx < W)
            m = mx if m is None else jnp.logical_and(m, mx)
        return m

    tap_masks = [bounds_mask(k // 3 - 1, k % 3 - 1) for k in range(9)]

    # ---- top BatchNorm2d(3): folded (R,1) scale / bias broadcast columns ----
    h = x_ref[...] * nscale_ref[...] + nbias_ref[...]

    # ---- 3 ResConvBlocks -----------------------------------------------------
    for blk in range(3):
        identity = h
        # conv1 (1x1, BN1 folded) + relu: (R,R) = w (x) I_B matrix on the MXU
        t = jnp.maximum(
            jnp.dot(a1_ref[blk], h, preferred_element_type=f32) + b1_ref[blk], 0.0)
        # conv2 (3x3, groups=3, BN2 folded) + relu:
        #   one stacked-diagonal (9R,R) dot yields all 9 channel-weighted taps;
        #   each aligned (R,HW) slice is shifted with pltpu.roll and masked.
        dwall = jnp.dot(dw_ref[blk], t, preferred_element_type=f32)       # (9R,HW)
        u = None
        for k in range(9):
            dy, dx = k // 3 - 1, k % 3 - 1
            chunk = dwall[k * R:(k + 1) * R, :]
            d = dy * W + dx
            if d != 0:
                chunk = pltpu.roll(chunk, (roll_sign * d) % HW, 1)
            if tap_masks[k] is not None:
                chunk = jnp.where(tap_masks[k], chunk, 0.0)
            u = chunk if u is None else u + chunk
        u = jnp.maximum(u + b2_ref[blk], 0.0)
        # conv3 (1x1, BN3 folded), + identity, relu
        v = jnp.dot(a3_ref[blk], u, preferred_element_type=f32) + b3_ref[blk]
        h = jnp.maximum(v + identity, 0.0)

    # ---- last grouped conv + squeeze over the non-proposal spatial dim ------
    # feat = sum_k (pattern_k * h) @ pool_k : tap shifts and border masks are
    # folded into the per-tap 0/1 pool matrices (pure matmuls, fully static).
    feat = None
    for k in range(3):
        term = jnp.dot(lwpat_ref[k] * h, pool_ref[k], preferred_element_type=f32)
        feat = term if feat is None else feat + term
    feat = feat + lb_ref[...]

    # ---- neck: 4 x (Linear + ReLU) -------------------------------------------
    z = feat
    for i in range(4):
        z = jnp.maximum(
            jnp.dot(z, nw_ref[i], preferred_element_type=f32) + nb_ref[i], 0.0)

    # ---- fused heads: p|c concatenated layer 0, block-diagonal layers 1-3 ----
    hh = jnp.maximum(
        jnp.dot(z, haw_ref[...], preferred_element_type=f32) + hab_ref[...], 0.0)
    for j in range(2):
        hh = jnp.maximum(
            jnp.dot(hh, hbw_ref[j], preferred_element_type=f32) + hbb_ref[j], 0.0)
    logits = jnp.dot(hh, hcw_ref[...], preferred_element_type=f32) + hcb_ref[...]
    sig = 1.0 / (1.0 + jnp.exp(-logits))            # exact sigmoid
    o_ref[...] = sig + post_ref[...]                # cols: [p | c_1+prior | c_2+prior]


# ----------------------------------------------------------------------------
# Parameter generation (synthetic, deterministic)
# ----------------------------------------------------------------------------
def init_raw_path(key, H, W, proposal_dim, nprop):
    L = H if proposal_dim == -2 else W
    L4 = L // 4
    ks = iter(jax.random.split(key, 80))

    def nrm(shape, s=0.2):
        return s * jax.random.normal(next(ks), shape, jnp.float32)

    blocks = []
    for _ in range(3):
        blocks.append(dict(
            w1=nrm((3, 3), 0.3), g1=1.0 + nrm((3,), 0.1), be1=nrm((3,), 0.1),
            w2=nrm((3, 3, 3), 0.3), g2=1.0 + nrm((3,), 0.1), be2=nrm((3,), 0.1),
            w3=nrm((3, 3), 0.3), g3=1.0 + nrm((3,), 0.1), be3=nrm((3,), 0.1)))
    kH, kW = (3, W) if proposal_dim == -2 else (H, 3)
    lw = nrm((3, kH, kW), 0.3)          # grouped last-conv weight (out_c, kH, kW)
    lb = nrm((3,), 0.1)
    # Linear weights stored already transposed: (in, out); biases (out,)
    neck = [(nrm((L, L)), nrm((L,), 0.1)) for _ in range(4)]
    dims_p = [(L, L4), (L4, L4), (L4, L4), (L4, nprop)]
    dims_c = [(L, L4), (L4, L4), (L4, L4), (L4, 2 * nprop)]
    head_p = [(nrm(d), nrm((d[1],), 0.1)) for d in dims_p]
    head_c = [(nrm(d), nrm((d[1],), 0.1)) for d in dims_c]
    prior = jnp.linspace(0.0, 0.9, nprop).astype(jnp.float32)
    return dict(blocks=blocks, lw=lw, lb=lb, neck=neck, head_p=head_p,
                head_c=head_c, prior=prior, proposal_dim=proposal_dim,
                L=L, L4=L4)


# ----------------------------------------------------------------------------
# Packing: fold BN, build (w (x) I_B) / stacked-diagonal matrices, bias
# columns, shifted+masked pool matrices, fused+padded neck/head weights.
# ----------------------------------------------------------------------------
def pack_path(raw, B, H, W, nprop, Lmax, L4max, padl):
    f32 = jnp.float32
    HW = H * W
    R = _round_up(3 * B, 8)
    L, L4 = raw['L'], raw['L4']
    pdim = raw['proposal_dim']
    eyeB = jnp.eye(B, dtype=f32)

    def chan_col(vec3):                    # per-channel (3,) -> (R,1) row column
        col = jnp.repeat(vec3.astype(f32), B)
        return jnp.zeros((R, 1), f32).at[:3 * B, 0].set(col)

    def embed_mix(w33, scale):             # 1x1 conv (+BN scale) -> (R,R)
        small = jnp.kron((scale[:, None] * w33).astype(f32), eyeB)      # (3B,3B)
        return jnp.zeros((R, R), f32).at[:3 * B, :3 * B].set(small)

    A1s, b1s, DWs, b2s, A3s, b3s = [], [], [], [], [], []
    for bp in raw['blocks']:
        s1, s2, s3 = _fold(bp['g1']), _fold(bp['g2']), _fold(bp['g3'])
        A1s.append(embed_mix(bp['w1'], s1)); b1s.append(chan_col(bp['be1']))
        A3s.append(embed_mix(bp['w3'], s3)); b3s.append(chan_col(bp['be3']))
        b2s.append(chan_col(bp['be2']))
        dstack = []
        for k in range(9):
            ky, kx = k // 3, k % 3
            dvec = jnp.repeat((s2 * bp['w2'][:, ky, kx]).astype(f32), B)
            dvec = jnp.zeros((R,), f32).at[:3 * B].set(dvec)
            dstack.append(jnp.diag(dvec))
        DWs.append(jnp.concatenate(dstack, axis=0))                     # (9R, R)
    A1s, A3s = jnp.stack(A1s), jnp.stack(A3s)
    b1s, b2s, b3s = jnp.stack(b1s), jnp.stack(b2s), jnp.stack(b3s)
    DWs = jnp.stack(DWs)

    # --- last grouped conv: lane-weight patterns + shifted/masked pool mats --
    lw = raw['lw'].astype(f32)
    lane = jnp.arange(HW)
    yq, xq = lane // W, lane % W
    lwpats, pools = [], []
    for k in range(3):
        if pdim == -2:                          # kernel (3, W): taps along y
            pat3 = jnp.tile(lw[:, k, :], (1, H))            # value w[c, k, x]
            tgt = yq - (k - 1)                              # output row index
        else:                                   # kernel (H, 3): taps along x
            pat3 = jnp.repeat(lw[:, :, k], W, axis=1)       # value w[c, y, k]
            tgt = xq - (k - 1)                              # output col index
        valid = jnp.logical_and(tgt >= 0, tgt < L)
        pat = jnp.repeat(pat3, B, axis=0)                   # rows (c, b)
        lwpats.append(jnp.zeros((R, HW), f32).at[:3 * B, :].set(pat))
        pool = (tgt[:, None] == jnp.arange(Lmax)[None, :]) & valid[:, None]
        pools.append(pool.astype(f32))                      # (HW, Lmax)
    lwpats, pools = jnp.stack(lwpats), jnp.stack(pools)
    lbcol = chan_col(raw['lb'])

    # --- neck (zero-padded to Lmax) ------------------------------------------
    nw = jnp.zeros((4, Lmax, Lmax), f32)
    nb = jnp.zeros((4, 1, Lmax), f32)
    for i, (w, b) in enumerate(raw['neck']):
        nw = nw.at[i, :L, :L].set(w.astype(f32))
        nb = nb.at[i, 0, :L].set(b.astype(f32))

    # --- fused heads (p | c), zero-padded to L4max ----------------------------
    (pw0, pb0), (pw1, pb1), (pw2, pb2), (pw3, pb3) = raw['head_p']
    (cw0, cb0), (cw1, cb1), (cw2, cb2), (cw3, cb3) = raw['head_c']
    haw = jnp.zeros((Lmax, 2 * L4max), f32)
    haw = haw.at[:L, :L4].set(pw0).at[:L, L4max:L4max + L4].set(cw0)
    hab = jnp.zeros((1, 2 * L4max), f32)
    hab = hab.at[0, :L4].set(pb0).at[0, L4max:L4max + L4].set(cb0)
    hbw = jnp.zeros((2, 2 * L4max, 2 * L4max), f32)
    hbb = jnp.zeros((2, 1, 2 * L4max), f32)
    for j, ((pw, pb), (cw, cb)) in enumerate((((pw1, pb1), (cw1, cb1)),
                                              ((pw2, pb2), (cw2, cb2)))):
        hbw = hbw.at[j, :L4, :L4].set(pw)
        hbw = hbw.at[j, L4max:L4max + L4, L4max:L4max + L4].set(cw)
        hbb = hbb.at[j, 0, :L4].set(pb).at[j, 0, L4max:L4max + L4].set(cb)
    hcw = jnp.zeros((2 * L4max, padl), f32)
    hcw = hcw.at[:L4, :nprop].set(pw3)
    hcw = hcw.at[L4max:L4max + L4, nprop:3 * nprop].set(cw3)
    hcb = jnp.zeros((1, padl), f32)
    hcb = hcb.at[0, :nprop].set(pb3).at[0, nprop:3 * nprop].set(cb3)
    post = jnp.zeros((1, padl), f32)
    post = post.at[0, nprop:2 * nprop].set(raw['prior'])
    post = post.at[0, 2 * nprop:3 * nprop].set(raw['prior'])

    return (A1s, b1s, DWs, b2s, A3s, b3s, lwpats, pools, lbcol,
            nw, nb, haw, hab, hbw, hbb, hcw, hcb, post)


# ----------------------------------------------------------------------------
# Forward wrapper: one pallas_call, grid=(2,) "parallel" over the two paths
# ----------------------------------------------------------------------------
def freq_conv_proposal_forward(x, gamma, beta, params, *, num_proposal, roll_sign):
    f32 = jnp.float32
    B, C, H, W = x.shape
    assert C == 3
    HW = H * W
    R = _round_up(3 * B, 8)
    padl = params[-1].shape[-1]

    # rows = channel-major (c, b) padded to 8 sublanes, lanes = y*W + x
    xt = jnp.transpose(x, (1, 0, 2, 3)).reshape(3 * B, HW).astype(f32)
    xt = jnp.pad(xt, ((0, R - 3 * B), (0, 0)))

    def chan_col(v):
        col = jnp.repeat(v.astype(f32), B)
        return jnp.pad(col, (0, R - 3 * B)).reshape(R, 1)

    nscale = chan_col(_fold(gamma))
    nbias = chan_col(beta)

    def _const_map(nd):
        def imap(i):
            return (0,) * nd
        return imap

    def _path_map(nd):
        def imap(i):
            return (i,) + (0,) * nd
        return imap

    def shared_spec(a):
        return pl.BlockSpec(a.shape, _const_map(a.ndim))

    def path_spec(a):
        return pl.BlockSpec((None,) + a.shape[1:], _path_map(a.ndim - 1))

    in_specs = [shared_spec(xt), shared_spec(nscale), shared_spec(nbias)]
    in_specs += [path_spec(a) for a in params]

    kernel = functools.partial(fused_kernel, H=H, W=W, R=R, roll_sign=roll_sign)

    cost = pl.CostEstimate(flops=3_000_000,
                           transcendentals=2 * R * padl,
                           bytes_accessed=300_000)

    out = pl.pallas_call(
        kernel,
        grid=(2,),                               # 2 independent proposal paths
        out_shape=jax.ShapeDtypeStruct((2, R, padl), f32),
        in_specs=in_specs,
        out_specs=pl.BlockSpec((None, R, padl), lambda i: (i, 0, 0)),
        compiler_params=pltpu.CompilerParams(dimension_semantics=("parallel",)),
        cost_estimate=cost,
    )(xt, nscale, nbias, *params)

    def unpack(slab):
        v = slab[:3 * B, :3 * num_proposal].reshape(3, B, 3 * num_proposal)
        v = jnp.transpose(v, (1, 0, 2))          # (B, 3, 3*nprop)
        return {'p': v[..., :num_proposal],
                'c_1': v[..., num_proposal:2 * num_proposal],
                'c_2': v[..., 2 * num_proposal:]}

    return {'x_proposal': unpack(out[0]), 'y_proposal': unpack(out[1])}


# ----------------------------------------------------------------------------
# Pure-JAX reference (same inference-mode BN folding) for numeric verification
# ----------------------------------------------------------------------------
def _ref_path(xn, raw, nprop):
    B, _, H, Wd = xn.shape
    h = xn
    for bp in raw['blocks']:
        s1, s2, s3 = _fold(bp['g1']), _fold(bp['g2']), _fold(bp['g3'])
        identity = h
        t = jnp.einsum('oc,bchw->bohw', bp['w1'], h, precision=_HI)
        t = jnp.maximum(s1[None, :, None, None] * t
                        + bp['be1'][None, :, None, None], 0.0)
        hp = jnp.pad(t, ((0, 0), (0, 0), (1, 1), (1, 1)))
        u = jnp.zeros_like(t)
        for ky in range(3):
            for kx in range(3):
                u = u + bp['w2'][None, :, ky, kx, None, None] * \
                    hp[:, :, ky:ky + H, kx:kx + Wd]
        u = jnp.maximum(s2[None, :, None, None] * u
                        + bp['be2'][None, :, None, None], 0.0)
        v = jnp.einsum('oc,bchw->bohw', bp['w3'], u, precision=_HI)
        v = s3[None, :, None, None] * v + bp['be3'][None, :, None, None]
        h = jnp.maximum(v + identity, 0.0)

    lw, lb = raw['lw'], raw['lb']
    if raw['proposal_dim'] == -2:
        hp = jnp.pad(h, ((0, 0), (0, 0), (1, 1), (0, 0)))
        out = jnp.zeros((B, 3, H), jnp.float32)
        for ky in range(3):
            out = out + jnp.einsum('cx,bcyx->bcy', lw[:, ky, :],
                                   hp[:, :, ky:ky + H, :], precision=_HI)
    else:
        hp = jnp.pad(h, ((0, 0), (0, 0), (0, 0), (1, 1)))
        out = jnp.zeros((B, 3, Wd), jnp.float32)
        for kx in range(3):
            out = out + jnp.einsum('cy,bcyx->bcx', lw[:, :, kx],
                                   hp[:, :, :, kx:kx + Wd], precision=_HI)
    z = out + lb[None, :, None]
    for w, b in raw['neck']:
        z = jnp.maximum(jnp.matmul(z, w, precision=_HI) + b, 0.0)

    def head(layers):
        hh = z
        for i, (w, b) in enumerate(layers):
            hh = jnp.matmul(hh, w, precision=_HI) + b
            if i < 3:
                hh = jnp.maximum(hh, 0.0)
        return 1.0 / (1.0 + jnp.exp(-hh))

    p = head(raw['head_p'])
    c = head(raw['head_c'])
    prior = raw['prior'][None, None, :]
    return {'p': p, 'c_1': c[:, :, :nprop] + prior, 'c_2': c[:, :, nprop:] + prior}


# ----------------------------------------------------------------------------
if __name__ == "__main__":
    key = jax.random.PRNGKey(0)
    B, C, H, W = 2, 3, 16, 8             # img_size = (H, W) = (16, 8), H*W = 128
    NUM_PROPOSAL = 4
    Lmax = max(H, W)
    L4max = Lmax // 4
    padl = _round_up(3 * NUM_PROPOSAL, 128)

    k_x, k_norm, k_xp, k_yp = jax.random.split(key, 4)
    x = jax.random.normal(k_x, (B, C, H, W), jnp.float32)
    kg, kb = jax.random.split(k_norm)
    gamma = 1.0 + 0.1 * jax.random.normal(kg, (3,), jnp.float32)
    beta = 0.1 * jax.random.normal(kb, (3,), jnp.float32)

    raw_x = init_raw_path(k_xp, H, W, -2, NUM_PROPOSAL)   # length = H = 16
    raw_y = init_raw_path(k_yp, H, W, -1, NUM_PROPOSAL)   # length = W = 8
    packed_x = pack_path(raw_x, B, H, W, NUM_PROPOSAL, Lmax, L4max, padl)
    packed_y = pack_path(raw_y, B, H, W, NUM_PROPOSAL, Lmax, L4max, padl)
    stacked = tuple(jnp.stack([ax, ay]) for ax, ay in zip(packed_x, packed_y))

    roll_sign = detect_roll_sign()

    fwd = jax.jit(functools.partial(freq_conv_proposal_forward,
                                    num_proposal=NUM_PROPOSAL,
                                    roll_sign=roll_sign))
    out = fwd(x, gamma, beta, stacked)
    out = jax.block_until_ready(out)

    # --- pure-JAX reference check (pins roll direction, packing, fused heads)
    xn = x * _fold(gamma)[None, :, None, None] + beta[None, :, None, None]
    ref = {'x_proposal': _ref_path(xn, raw_x, NUM_PROPOSAL),
           'y_proposal': _ref_path(xn, raw_y, NUM_PROPOSAL)}
    for pname in ('x_proposal', 'y_proposal'):
        for k2 in ('p', 'c_1', 'c_2'):
            got = out[pname][k2]
            want = ref[pname][k2]
            assert got.shape == (B, 3, NUM_PROPOSAL)
            err = float(jnp.max(jnp.abs(got - want)))
            assert err < 3e-2, f"{pname}/{k2} mismatch: max|diff|={err}"
    print("KERNEL_OK")
</pallas_src>

<mosaic_0001>
module attributes {stable_mosaic.version = 11 : i64} {
  func.func @_roll_probe_kernel(%arg0: memref<8x128xf32, #tpu.memory_space<vmem>>, %arg1: memref<8x128xf32, #tpu.memory_space<vmem>>) attributes {dimension_semantics = [], scalar_prefetch = 0 : i64, scratch_operands = 0 : i64, tpu.core_type = #tpu.core_type<tc>} {
    %c0 = arith.constant 0 : index
    %c0_0 = arith.constant 0 : index
    %0 = vector.load %arg0[%c0, %c0_0] : memref<8x128xf32, #tpu.memory_space<vmem>>, vector<8x128xf32>
    %c1_i32 = arith.constant 1 : i32
    %1 = tpu.dynamic_rotate %0 by %c1_i32 dim 1 : vector<8x128xf32>, i32 -> vector<8x128xf32>
    %c0_1 = arith.constant 0 : index
    %c0_2 = arith.constant 0 : index
    %2 = vector.load %arg1[%c0_1, %c0_2] : memref<8x128xf32, #tpu.memory_space<vmem>>, vector<8x128xf32>
    tpu.vector_store %arg1[%c0_1, %c0_2], %1 {strides = array<i32>} : memref<8x128xf32, #tpu.memory_space<vmem>>, vector<8x128xf32>,
    return
  }
}

</mosaic_0001>

<bundles_post_ra>
// kernel: tpu_custom_call.1
= control target key start
LH: loop header
LB: loop body
LE: loop exit
PB: predicated region body
PF: predicated region fallthrough
CT: control target
= control target key end

     0   :  { %6 = vsyncpa [#allocation3], 0  ;;  %s128_s0 = inlined_call_operand.hbm [shape: f32[8,128], index: 0, kind: input, shape index: {}]   ;;  %s129_s1 = inlined_call_operand.hbm [shape: f32[8,128], index: 1, kind: output, shape index: {}]  }
   0x1   :  { %7 = vsyncpa [#allocation4], 0  ;;  %s91_s6 = smov [#allocation2]   ;;  %s43_s10 = scalar_lea.hbm %s128_s0, 128 }
   0x2   :  { %s14_s7 = sshll.u32 %s91_s6, 4  ;;  %p44_p0 = scmp.ne.s32.totalorder %s128_s0, %s43_s10  ;;  %s15_s7 = int_to_ptr.vmem [resolvable:$true] %s14_s7 }
   0x3   :  { %p47_p1 = scmp.lt.u32.totalorder %s43_s10, %s128_s0 }
   0x5   :  { %p49_p2 = pnand %p47_p1, %p44_p0 }
   0x7   :  { %52 = shalt.err (!%p49_p2)
}
   0x8   :  { %s53_s15 = scalar_lea.vmem %s15_s7, 128  ;;  %p58_p4 = scmp.lt.s32.totalorder %s15_s7, %s15_s7 }
   0x9   :  { %p54_p3 = scmp.ne.s32.totalorder %s15_s7, %s53_s15  ;;  %p59_p5 = scmp.lt.s32.totalorder %s53_s15, %s53_s15 }
   0xb   :  { %p60_p6 = por %p59_p5, %p58_p4 }
   0xd   :  { %p61_p7 = pnand %p60_p6, %p54_p3 }
   0xf   :  { %64 = shalt.err (!%p61_p7)
}
  0x10   :  { %17 = dma.hbm_to_vmem [thread:$0]  %s128_s0, 128, %s15_s7, [#allocation3]  }
  0x11   :  { %87 = dma.done.wait [#allocation3], 128  }
  0x12   :  { %88 = vsyncadd [#allocation3], 4294967168  ;;  %v21_v0 = vld [vmem:[#allocation2] sm:$0xff]  ;;  %s92_s18 = smov 1   ;;  %s93_s19 = smov [#allocation5]  }
  0x13   :  { %22 = vrot.lane.b32.xlu0 %v21_v0, %s92_s18  ;;  %s31_s20 = sshll.u32 %s93_s19, 4  ;;  %s32_s20 = int_to_ptr.vmem [resolvable:$true] %s31_s20 }
  0x14   :  { %s65_s21 = scalar_lea.vmem %s32_s20, 128  ;;  %p70_p9 = scmp.lt.s32.totalorder %s32_s20, %s32_s20 }
  0x15   :  { %p66_p8 = scmp.ne.s32.totalorder %s32_s20, %s65_s21  ;;  %p71_p10 = scmp.lt.s32.totalorder %s65_s21, %s65_s21 }
  0x17   :  { %p72_p11 = por %p71_p10, %p70_p9 }
  0x19   :  { %p73_p12 = pnand %p72_p11, %p66_p8 }
  0x85   :  { %v23_v1 = vpop.permute.xlu0 %22 }
  0x86   :  { %24 = vst [vmem:[#allocation5] sm:$0xff] %v23_v1 }
  0x87   :  { %76 = shalt.err (!%p73_p12)
}
  0x88   :  { %s77_s0 = scalar_lea.hbm %s129_s1, 128 }
  0x89   :  { %p78_p13 = scmp.ne.s32.totalorder %s129_s1, %s77_s0  ;;  %p81_p0 = scmp.lt.u32.totalorder %s77_s0, %s129_s1 }
  0x8b   :  { %p83_p1 = pnand %p81_p0, %p78_p13 }
  0x8d   :  { %86 = shalt.err (!%p83_p1)
}
  0x8e   :  { %34 = dma.vmem_to_hbm [thread:$0]  %s32_s20, 128, %s129_s1, [#allocation4]  }
  0x8f   :  { %89 = dma.done.wait [#allocation4], 128  }
  0x90   :  { %90 = vsyncadd [#allocation4], 4294967168 }
  0x91   :  { %38 = vsyncpa [#allocation3], 1 }
  0x92   :  { %39 = vsyncpa [#allocation4], 1 }

</bundles_post_ra>
